<compile_context>
chip_gen: v5e
topology: v5e:2x2
jax: 0.10.0
libtpu: 0.0.40
codegen_flags: <defaults>
</compile_context>

<pallas_src>
import jax
import jax.numpy as jnp
from jax.experimental import pallas as pl
from jax.experimental.pallas import tpu as pltpu

F32B, BF16B = 4, 2


def channel_mix_kernel(x_ref, xs_ref, maa_k_ref, maa_r_ref,
                       wk_ref, wr_ref, wv_ref, o_ref,
                       xk_scr, r_scr, kv_scr):
    """One (TT, C) token slab; the second grid axis reduces over F chunks."""
    f = pl.program_id(1)

    @pl.when(f == 0)
    def _init():
        x = x_ref[...].astype(jnp.float32)              # (TT, C)  bf16 -> f32
        xx = xs_ref[...].astype(jnp.float32) - x        # time_shift(x) - x
        xk = x + xx * maa_k_ref[...]                    # (1, C) broadcasts over TT
        xr = x + xx * maa_r_ref[...]
        xk_scr[...] = xk.astype(jnp.bfloat16)           # MXU operand reused per F chunk
        r = jnp.dot(xr.astype(jnp.bfloat16), wr_ref[...],
                    preferred_element_type=jnp.float32)
        r_scr[...] = jax.nn.sigmoid(r)                  # f32 epilogue
        kv_scr[...] = jnp.zeros_like(kv_scr)

    # k_chunk = relu(xk @ Wk^T[:, f*Fc:(f+1)*Fc]) ** 2        -> (TT, Fc) f32
    k = jnp.dot(xk_scr[...], wk_ref[...], preferred_element_type=jnp.float32)
    k = jnp.maximum(k, 0.0)
    k = k * k
    # kv += k_chunk @ Wv^T[f*Fc:(f+1)*Fc, :]                  -> (TT, C) f32 accumulate
    kv_scr[...] += jnp.dot(k.astype(jnp.bfloat16), wv_ref[...],
                           preferred_element_type=jnp.float32)

    @pl.when(f == pl.num_programs(1) - 1)
    def _finish():
        o_ref[...] = (r_scr[...] * kv_scr[...]).astype(o_ref.dtype)


def _round_up(x, m):
    return ((x + m - 1) // m) * m


def _pick_tile(dim, target, align):
    """Largest tile <= target that divides `dim` and is a multiple of `align`,
    else the full dim (full-extent blocks are always layout-legal)."""
    if dim <= target:
        return dim
    t = (target // align) * align
    while t >= align:
        if dim % t == 0:
            return t
        t -= align
    return dim


def _vmem_capacity_bytes():
    try:
        cap = int(pltpu.get_tpu_info().vmem_capacity_bytes)
        if cap > 0:
            return cap
    except Exception:
        pass
    return 64 * 1024 * 1024          # conservative (v7x-sized) fallback


def _choose_tiles(M, C, F, vmem_cap):
    """Generation-aware tile selection driven by VMEM capacity."""
    budget = int(0.85 * vmem_cap)
    headroom = 2 << 20               # Mosaic internal scratch

    # Weight residency (v5e/v6e, 128 MiB): keep the full Wk^T/Wv^T in VMEM when
    # they fit in ~1/3 of VMEM -> weights DMA'd once per call, not once per slab.
    if 2 * C * F * BF16B <= vmem_cap // 3:
        Fc, w_bufs = F, 1            # constant block index -> single buffer
    else:
        small_vmem = vmem_cap < (100 << 20)      # v7x-class
        Fc = _pick_tile(F, 512 if small_vmem else 2048, 128)
        w_bufs = 3 if small_vmem else 2          # 3rd buffer hides chunk DMA on v7x

    # VMEM independent of the token tile.
    fixed = (w_bufs * 2 * C * Fc * BF16B         # Wk^T / Wv^T chunks
             + C * C * BF16B                     # Wr^T (single buffer)
             + 2 * C * F32B                      # time_maa_k / time_maa_r
             + headroom)

    # VMEM per token row.
    per_row = (2 * 2 * C * BF16B                 # x + x_shift (bf16, double-buffered)
               + 2 * C * F32B                    # output tile (double-buffered)
               + C * (BF16B + 2 * F32B)          # xk / r / kv scratch
               + Fc * (F32B + BF16B))            # relu^2 intermediate + bf16 recast

    # Tokens per weight pass: beyond the HBM/MXU balance point per generation.
    tt_target = 768 if vmem_cap >= (100 << 20) else 512
    tt_cap = max((budget - fixed) // per_row, 8)
    TT = int(min(tt_target, tt_cap, _round_up(M, 8)))
    for align in (256, 128, 8):                  # MXU M-dimension alignment
        if TT >= align:
            TT = (TT // align) * align
            break

    vmem_est = fixed + TT * per_row
    return TT, Fc, w_bufs, vmem_est


def prepare_channel_mix_params(time_maa_k, time_maa_r, w_key, w_receptance, w_value):
    """One-time weight prep (transpose + bf16 cast) hoisted out of the per-call path."""
    C = w_receptance.shape[0]
    return {
        "maa_k": jnp.asarray(time_maa_k, jnp.float32).reshape(1, C),
        "maa_r": jnp.asarray(time_maa_r, jnp.float32).reshape(1, C),
        "wk_t": jnp.asarray(w_key).T.astype(jnp.bfloat16),          # (C, F)
        "wr_t": jnp.asarray(w_receptance).T.astype(jnp.bfloat16),   # (C, C)
        "wv_t": jnp.asarray(w_value).T.astype(jnp.bfloat16),        # (F, C)
    }


def rwkv_channel_mix(x, params, *, conservative=False):
    """
    x:      (B, T, C) float32
    params: dict from prepare_channel_mix_params
    returns (B, T, C), x.dtype
    """
    B, T, C = x.shape
    Cw, F = params["wk_t"].shape
    assert Cw == C

    # time_shift: shifted[:, t] = x[:, t-1], shifted[:, 0] = 0  (ZeroPad2d((0,0,1,-1))).
    # Precomputed per batch row so flattening (B, T) -> M afterwards is safe.
    x_shift = jnp.pad(x, ((0, 0), (1, 0), (0, 0)))[:, :-1, :]

    M = B * T
    vmem_cap = _vmem_capacity_bytes()
    TT, Fc, w_bufs, vmem_est = _choose_tiles(M, C, F, vmem_cap)
    nM = (M + TT - 1) // TT
    nF = F // Fc
    M_pad = nM * TT

    # bf16 activations: halves HBM read traffic and the x/x_shift VMEM buffers.
    x_flat = x.reshape(M, C).astype(jnp.bfloat16)
    xs_flat = x_shift.reshape(M, C).astype(jnp.bfloat16)
    if M_pad != M:
        pad = ((0, M_pad - M), (0, 0))
        x_flat = jnp.pad(x_flat, pad)
        xs_flat = jnp.pad(xs_flat, pad)

    vmem_limit = int(min(max(2 * vmem_est, 32 << 20), int(0.9 * vmem_cap)))

    # Advisory cost: weights re-stream once per token slab unless resident (nF == 1).
    w_stream = (nM if nF > 1 else 1) * 2 * C * F * BF16B + C * C * BF16B
    cost = pl.CostEstimate(
        flops=2 * M_pad * (2 * C * F + C * C),
        transcendentals=M_pad * C,                                   # sigmoid
        bytes_accessed=int(2 * M_pad * C * BF16B + M_pad * C * F32B
                           + w_stream + 2 * C * F32B),
    )

    def spec(shape, index_map, bufs=None):
        if conservative or bufs is None:
            return pl.BlockSpec(shape, index_map)
        return pl.BlockSpec(shape, index_map, pipeline_mode=pl.Buffered(bufs))

    grid_spec = pltpu.PrefetchScalarGridSpec(
        num_scalar_prefetch=0,
        grid=(nM, nF),
        in_specs=[
            spec((TT, C), lambda i, f: (i, 0)),                      # x (bf16)
            spec((TT, C), lambda i, f: (i, 0)),                      # time_shift(x)
            spec((1, C), lambda i, f: (0, 0), bufs=1),               # time_maa_k
            spec((1, C), lambda i, f: (0, 0), bufs=1),               # time_maa_r
            spec((C, Fc), lambda i, f: (0, f), bufs=w_bufs),         # Wk^T chunk
            spec((C, C), lambda i, f: (0, 0), bufs=1),               # Wr^T (resident)
            spec((Fc, C), lambda i, f: (f, 0), bufs=w_bufs),         # Wv^T chunk
        ],
        out_specs=pl.BlockSpec((TT, C), lambda i, f: (i, 0)),
        scratch_shapes=[
            pltpu.VMEM((TT, C), jnp.bfloat16),   # xk (bf16 MXU operand, reused over F)
            pltpu.VMEM((TT, C), jnp.float32),    # sigmoid(r)
            pltpu.VMEM((TT, C), jnp.float32),    # kv accumulator
        ],
    )

    out_flat = pl.pallas_call(
        channel_mix_kernel,
        out_shape=jax.ShapeDtypeStruct((M_pad, C), x.dtype),
        grid_spec=grid_spec,
        compiler_params=pltpu.CompilerParams(
            dimension_semantics=("parallel", "arbitrary"),
            vmem_limit_bytes=vmem_limit,
        ),
        cost_estimate=cost,
    )(x_flat, xs_flat, params["maa_k"], params["maa_r"],
      params["wk_t"], params["wr_t"], params["wv_t"])

    return out_flat[:M].reshape(B, T, C)


def reference_channel_mix(x, time_maa_k, time_maa_r, w_key, w_receptance, w_value):
    """Pure-JAX f32 reference mirroring the PyTorch forward exactly."""
    shifted = jnp.pad(x, ((0, 0), (1, 0), (0, 0)))[:, :-1, :]   # ZeroPad2d((0,0,1,-1))
    xx = shifted - x
    xk = x + xx * time_maa_k
    xr = x + xx * time_maa_r
    k = xk @ w_key.T
    k = jnp.maximum(k, 0.0) ** 2
    kv = k @ w_value.T
    return jax.nn.sigmoid(xr @ w_receptance.T) * kv


if __name__ == "__main__":
    # Small, module-consistent shapes
    B, T = 2, 8
    hidden_size = 32          # neox_args.hidden_size
    ffn_dim = 128             # neox_args.ffn_dim
    num_layers = 4
    layer_number = 1

    # Deterministic parameter init (mirrors the module __init__ math)
    ratio_1_to_almost0 = 1.0 - layer_number / num_layers
    ddd = (jnp.arange(hidden_size, dtype=jnp.float32) / hidden_size).reshape(1, 1, hidden_size)
    time_maa_k = 1.0 - jnp.power(ddd, ratio_1_to_almost0)
    time_maa_r = 1.0 - jnp.power(ddd, ratio_1_to_almost0)

    key = jax.random.PRNGKey(0)
    k_x, k_wk, k_wr, k_wv = jax.random.split(key, 4)
    x = jax.random.normal(k_x, (B, T, hidden_size), dtype=jnp.float32)
    w_key = jax.random.normal(k_wk, (ffn_dim, hidden_size), dtype=jnp.float32) * 0.05
    w_receptance = jax.random.normal(k_wr, (hidden_size, hidden_size), dtype=jnp.float32) * 0.05
    w_value = jax.random.normal(k_wv, (hidden_size, ffn_dim), dtype=jnp.float32) * 0.05

    params = prepare_channel_mix_params(time_maa_k, time_maa_r,
                                        w_key, w_receptance, w_value)

    try:
        out = jax.block_until_ready(rwkv_channel_mix(x, params))
    except Exception:
        # Safety net: retry without pipeline_mode hints if Buffered(n) is rejected.
        out = jax.block_until_ready(rwkv_channel_mix(x, params, conservative=True))

    ref = reference_channel_mix(x, time_maa_k, time_maa_r,
                                w_key, w_receptance, w_value)
    assert out.shape == (B, T, hidden_size)
    max_err = float(jnp.max(jnp.abs(out - ref)))
    # bf16 MXU operands / activations with f32 accumulation -> relaxed tolerance
    assert jnp.allclose(out, ref, atol=2e-2, rtol=2e-2), (
        f"Pallas output mismatch vs reference (max abs err {max_err})")

    print("KERNEL_OK")
</pallas_src>

<mosaic_0001>
module attributes {stable_mosaic.version = 11 : i64} {
  func.func @channel_mix_kernel(%arg0: i32, %arg1: i32, %arg2: memref<16x32xbf16, #tpu.memory_space<vmem>>, %arg3: memref<16x32xbf16, #tpu.memory_space<vmem>>, %arg4: memref<1x32xf32, #tpu.memory_space<vmem>>, %arg5: memref<1x32xf32, #tpu.memory_space<vmem>>, %arg6: memref<32x128xbf16, #tpu.memory_space<vmem>>, %arg7: memref<32x32xbf16, #tpu.memory_space<vmem>>, %arg8: memref<128x32xbf16, #tpu.memory_space<vmem>>, %arg9: memref<16x32xf32, #tpu.memory_space<vmem>>, %arg10: memref<16x32xbf16, #tpu.memory_space<vmem>>, %arg11: memref<16x32xf32, #tpu.memory_space<vmem>>, %arg12: memref<16x32xf32, #tpu.memory_space<vmem>>) attributes {dimension_semantics = [#tpu.dimension_semantics<parallel>, #tpu.dimension_semantics<arbitrary>], iteration_bounds = array<i64: 1, 1>, scalar_prefetch = 0 : i64, scratch_operands = 3 : i64, tpu.core_type = #tpu.core_type<tc>, window_params = [{transform_indices = @transform_0, window_bounds = array<i64: 16, 32>}, {transform_indices = @transform_1, window_bounds = array<i64: 16, 32>}, {pipeline_mode = #tpu.pipeline_mode<synchronous>, transform_indices = @transform_2, window_bounds = array<i64: 1, 32>}, {pipeline_mode = #tpu.pipeline_mode<synchronous>, transform_indices = @transform_3, window_bounds = array<i64: 1, 32>}, {pipeline_mode = #tpu.pipeline_mode<synchronous>, transform_indices = @transform_4, window_bounds = array<i64: 32, 128>}, {pipeline_mode = #tpu.pipeline_mode<synchronous>, transform_indices = @transform_5, window_bounds = array<i64: 32, 32>}, {pipeline_mode = #tpu.pipeline_mode<synchronous>, transform_indices = @transform_6, window_bounds = array<i64: 128, 32>}, {transform_indices = @transform_7, window_bounds = array<i64: 16, 32>}]} {
    %c0_i32 = arith.constant 0 : i32
    %0 = arith.cmpi eq, %arg1, %c0_i32 : i32
    %1 = arith.extui %0 : i1 to i32
    %c0_i32_0 = arith.constant 0 : i32
    %2 = arith.cmpi ne, %1, %c0_i32_0 : i32
    scf.if %2 {
      %c0_14 = arith.constant 0 : index
      %c0_15 = arith.constant 0 : index
      %18 = vector.load %arg2[%c0_14, %c0_15] : memref<16x32xbf16, #tpu.memory_space<vmem>>, vector<16x32xbf16>
      %19 = arith.extf %18 : vector<16x32xbf16> to vector<16x32xf32>
      %c0_16 = arith.constant 0 : index
      %c0_17 = arith.constant 0 : index
      %20 = vector.load %arg3[%c0_16, %c0_17] : memref<16x32xbf16, #tpu.memory_space<vmem>>, vector<16x32xbf16>
      %21 = arith.extf %20 : vector<16x32xbf16> to vector<16x32xf32>
      %22 = arith.subf %21, %19 : vector<16x32xf32>
      %c0_18 = arith.constant 0 : index
      %c0_19 = arith.constant 0 : index
      %23 = vector.load %arg4[%c0_18, %c0_19] : memref<1x32xf32, #tpu.memory_space<vmem>>, vector<1x32xf32>
      %24 = vector.broadcast %23 : vector<1x32xf32> to vector<16x32xf32>
      %25 = arith.mulf %22, %24 : vector<16x32xf32>
      %26 = arith.addf %19, %25 : vector<16x32xf32>
      %c0_20 = arith.constant 0 : index
      %c0_21 = arith.constant 0 : index
      %27 = vector.load %arg5[%c0_20, %c0_21] : memref<1x32xf32, #tpu.memory_space<vmem>>, vector<1x32xf32>
      %28 = vector.broadcast %27 : vector<1x32xf32> to vector<16x32xf32>
      %29 = arith.mulf %22, %28 : vector<16x32xf32>
      %30 = arith.addf %19, %29 : vector<16x32xf32>
      %31 = arith.truncf %26 : vector<16x32xf32> to vector<16x32xbf16>
      %c0_22 = arith.constant 0 : index
      %c0_23 = arith.constant 0 : index
      %32 = vector.load %arg10[%c0_22, %c0_23] : memref<16x32xbf16, #tpu.memory_space<vmem>>, vector<16x32xbf16>
      tpu.vector_store %arg10[%c0_22, %c0_23], %31 {strides = array<i32>} : memref<16x32xbf16, #tpu.memory_space<vmem>>, vector<16x32xbf16>,
      %33 = arith.truncf %30 : vector<16x32xf32> to vector<16x32xbf16>
      %c0_24 = arith.constant 0 : index
      %c0_25 = arith.constant 0 : index
      %34 = vector.load %arg7[%c0_24, %c0_25] : memref<32x32xbf16, #tpu.memory_space<vmem>>, vector<32x32xbf16>
      %cst_26 = arith.constant dense<0.000000e+00> : vector<16x32xf32>
      %35 = tpu.matmul %33, %34, %cst_26 {dimension_numbers = #tpu.dot_dimension_numbers<[1], [0], [0], [1], [0, 0, 1, 1], [], []>} : vector<16x32xbf16>, vector<32x32xbf16>, vector<16x32xf32> -> vector<16x32xf32>
      %36 = arith.negf %35 : vector<16x32xf32>
      %37 = math.exp %36 : vector<16x32xf32>
      %cst_27 = arith.constant 1.000000e+00 : f32
      %38 = vector.broadcast %cst_27 : f32 to vector<16x32xf32>
      %39 = arith.addf %38, %37 : vector<16x32xf32>
      %40 = arith.divf %38, %39 : vector<16x32xf32>
      %c0_28 = arith.constant 0 : index
      %c0_29 = arith.constant 0 : index
      %41 = vector.load %arg11[%c0_28, %c0_29] : memref<16x32xf32, #tpu.memory_space<vmem>>, vector<16x32xf32>
      tpu.vector_store %arg11[%c0_28, %c0_29], %40 {strides = array<i32>} : memref<16x32xf32, #tpu.memory_space<vmem>>, vector<16x32xf32>,
      %cst_30 = arith.constant 0.000000e+00 : f32
      %42 = vector.broadcast %cst_30 : f32 to vector<16x32xf32>
      %c0_31 = arith.constant 0 : index
      %c0_32 = arith.constant 0 : index
      %43 = vector.load %arg12[%c0_31, %c0_32] : memref<16x32xf32, #tpu.memory_space<vmem>>, vector<16x32xf32>
      tpu.vector_store %arg12[%c0_31, %c0_32], %42 {strides = array<i32>} : memref<16x32xf32, #tpu.memory_space<vmem>>, vector<16x32xf32>,
    } else {
    }
    %c0 = arith.constant 0 : index
    %c0_1 = arith.constant 0 : index
    %3 = vector.load %arg10[%c0, %c0_1] : memref<16x32xbf16, #tpu.memory_space<vmem>>, vector<16x32xbf16>
    %c0_2 = arith.constant 0 : index
    %c0_3 = arith.constant 0 : index
    %4 = vector.load %arg6[%c0_2, %c0_3] : memref<32x128xbf16, #tpu.memory_space<vmem>>, vector<32x128xbf16>
    %cst = arith.constant dense<0.000000e+00> : vector<16x128xf32>
    %5 = tpu.matmul %3, %4, %cst {dimension_numbers = #tpu.dot_dimension_numbers<[1], [0], [0], [1], [0, 0, 1, 1], [], []>} : vector<16x32xbf16>, vector<32x128xbf16>, vector<16x128xf32> -> vector<16x128xf32>
    %cst_4 = arith.constant 0.000000e+00 : f32
    %6 = vector.broadcast %cst_4 : f32 to vector<16x128xf32>
    %7 = arith.maximumf %5, %6 : vector<16x128xf32>
    %8 = arith.mulf %7, %7 : vector<16x128xf32>
    %c0_5 = arith.constant 0 : index
    %c0_6 = arith.constant 0 : index
    %9 = vector.load %arg12[%c0_5, %c0_6] : memref<16x32xf32, #tpu.memory_space<vmem>>, vector<16x32xf32>
    %10 = arith.truncf %8 : vector<16x128xf32> to vector<16x128xbf16>
    %c0_7 = arith.constant 0 : index
    %c0_8 = arith.constant 0 : index
    %11 = vector.load %arg8[%c0_7, %c0_8] : memref<128x32xbf16, #tpu.memory_space<vmem>>, vector<128x32xbf16>
    %cst_9 = arith.constant dense<0.000000e+00> : vector<16x32xf32>
    %12 = tpu.matmul %10, %11, %cst_9 {dimension_numbers = #tpu.dot_dimension_numbers<[1], [0], [0], [1], [0, 0, 1, 1], [], []>} : vector<16x128xbf16>, vector<128x32xbf16>, vector<16x32xf32> -> vector<16x32xf32>
    %13 = arith.addf %9, %12 : vector<16x32xf32>
    %c0_10 = arith.constant 0 : index
    %c0_11 = arith.constant 0 : index
    %14 = vector.load %arg12[%c0_10, %c0_11] : memref<16x32xf32, #tpu.memory_space<vmem>>, vector<16x32xf32>
    tpu.vector_store %arg12[%c0_10, %c0_11], %13 {strides = array<i32>} : memref<16x32xf32, #tpu.memory_space<vmem>>, vector<16x32xf32>,
    %c0_i32_12 = arith.constant 0 : i32
    %15 = arith.cmpi eq, %arg1, %c0_i32_12 : i32
    %16 = arith.extui %15 : i1 to i32
    %c0_i32_13 = arith.constant 0 : i32
    %17 = arith.cmpi ne, %16, %c0_i32_13 : i32
    scf.if %17 {
      %c0_14 = arith.constant 0 : index
      %c0_15 = arith.constant 0 : index
      %18 = vector.load %arg11[%c0_14, %c0_15] : memref<16x32xf32, #tpu.memory_space<vmem>>, vector<16x32xf32>
      %c0_16 = arith.constant 0 : index
      %c0_17 = arith.constant 0 : index
      %19 = vector.load %arg12[%c0_16, %c0_17] : memref<16x32xf32, #tpu.memory_space<vmem>>, vector<16x32xf32>
      %20 = arith.mulf %18, %19 : vector<16x32xf32>
      %c0_18 = arith.constant 0 : index
      %c0_19 = arith.constant 0 : index
      %21 = vector.load %arg9[%c0_18, %c0_19] : memref<16x32xf32, #tpu.memory_space<vmem>>, vector<16x32xf32>
      tpu.vector_store %arg9[%c0_18, %c0_19], %20 {strides = array<i32>} : memref<16x32xf32, #tpu.memory_space<vmem>>, vector<16x32xf32>,
    } else {
    }
    return
  }
  func.func @transform_0(%arg0: i32, %arg1: i32) -> (i32, i32) {
    %c0_i32 = arith.constant 0 : i32
    %c0_i32_0 = arith.constant 0 : i32
    return %arg0, %c0_i32 : i32, i32
  }
  func.func @transform_1(%arg0: i32, %arg1: i32) -> (i32, i32) {
    %c0_i32 = arith.constant 0 : i32
    %c0_i32_0 = arith.constant 0 : i32
    return %arg0, %c0_i32 : i32, i32
  }
  func.func @transform_2(%arg0: i32, %arg1: i32) -> (i32, i32) {
    %c0_i32 = arith.constant 0 : i32
    %c0_i32_0 = arith.constant 0 : i32
    %c0_i32_1 = arith.constant 0 : i32
    return %c0_i32, %c0_i32_0 : i32, i32
  }
  func.func @transform_3(%arg0: i32, %arg1: i32) -> (i32, i32) {
    %c0_i32 = arith.constant 0 : i32
    %c0_i32_0 = arith.constant 0 : i32
    %c0_i32_1 = arith.constant 0 : i32
    return %c0_i32, %c0_i32_0 : i32, i32
  }
  func.func @transform_4(%arg0: i32, %arg1: i32) -> (i32, i32) {
    %c0_i32 = arith.constant 0 : i32
    %c0_i32_0 = arith.constant 0 : i32
    return %c0_i32, %arg1 : i32, i32
  }
  func.func @transform_5(%arg0: i32, %arg1: i32) -> (i32, i32) {
    %c0_i32 = arith.constant 0 : i32
    %c0_i32_0 = arith.constant 0 : i32
    %c0_i32_1 = arith.constant 0 : i32
    return %c0_i32, %c0_i32_0 : i32, i32
  }
  func.func @transform_6(%arg0: i32, %arg1: i32) -> (i32, i32) {
    %c0_i32 = arith.constant 0 : i32
    %c0_i32_0 = arith.constant 0 : i32
    return %arg1, %c0_i32 : i32, i32
  }
  func.func @transform_7(%arg0: i32, %arg1: i32) -> (i32, i32) {
    %c0_i32 = arith.constant 0 : i32
    %c0_i32_0 = arith.constant 0 : i32
    return %arg0, %c0_i32 : i32, i32
  }
}

module attributes {stable_mosaic.version = 11 : i64} {
  func.func @channel_mix_kernel(%arg0: i32, %arg1: i32, %arg2: memref<16x32xbf16, #tpu.memory_space<vmem>>, %arg3: memref<16x32xbf16, #tpu.memory_space<vmem>>, %arg4: memref<1x32xf32, #tpu.memory_space<vmem>>, %arg5: memref<1x32xf32, #tpu.memory_space<vmem>>, %arg6: memref<32x128xbf16, #tpu.memory_space<vmem>>, %arg7: memref<32x32xbf16, #tpu.memory_space<vmem>>, %arg8: memref<128x32xbf16, #tpu.memory_space<vmem>>, %arg9: memref<16x32xf32, #tpu.memory_space<vmem>>, %arg10: memref<16x32xbf16, #tpu.memory_space<vmem>>, %arg11: memref<16x32xf32, #tpu.memory_space<vmem>>, %arg12: memref<16x32xf32, #tpu.memory_space<vmem>>) attributes {dimension_semantics = [#tpu.dimension_semantics<parallel>, #tpu.dimension_semantics<arbitrary>], iteration_bounds = array<i64: 1, 1>, scalar_prefetch = 0 : i64, scratch_operands = 3 : i64, tpu.core_type = #tpu.core_type<tc>, window_params = [{transform_indices = @transform_0, window_bounds = array<i64: 16, 32>}, {transform_indices = @transform_1, window_bounds = array<i64: 16, 32>}, {pipeline_mode = #tpu.pipeline_mode<synchronous>, transform_indices = @transform_2, window_bounds = array<i64: 1, 32>}, {pipeline_mode = #tpu.pipeline_mode<synchronous>, transform_indices = @transform_3, window_bounds = array<i64: 1, 32>}, {transform_indices = @transform_4, window_bounds = array<i64: 32, 128>}, {pipeline_mode = #tpu.pipeline_mode<synchronous>, transform_indices = @transform_5, window_bounds = array<i64: 32, 32>}, {transform_indices = @transform_6, window_bounds = array<i64: 128, 32>}, {transform_indices = @transform_7, window_bounds = array<i64: 16, 32>}]} {
    %c0_i32 = arith.constant 0 : i32
    %0 = arith.cmpi eq, %arg1, %c0_i32 : i32
    %1 = arith.extui %0 : i1 to i32
    %c0_i32_0 = arith.constant 0 : i32
    %2 = arith.cmpi ne, %1, %c0_i32_0 : i32
    scf.if %2 {
      %c0_14 = arith.constant 0 : index
      %c0_15 = arith.constant 0 : index
      %18 = vector.load %arg2[%c0_14, %c0_15] : memref<16x32xbf16, #tpu.memory_space<vmem>>, vector<16x32xbf16>
      %19 = arith.extf %18 : vector<16x32xbf16> to vector<16x32xf32>
      %c0_16 = arith.constant 0 : index
      %c0_17 = arith.constant 0 : index
      %20 = vector.load %arg3[%c0_16, %c0_17] : memref<16x32xbf16, #tpu.memory_space<vmem>>, vector<16x32xbf16>
      %21 = arith.extf %20 : vector<16x32xbf16> to vector<16x32xf32>
      %22 = arith.subf %21, %19 : vector<16x32xf32>
      %c0_18 = arith.constant 0 : index
      %c0_19 = arith.constant 0 : index
      %23 = vector.load %arg4[%c0_18, %c0_19] : memref<1x32xf32, #tpu.memory_space<vmem>>, vector<1x32xf32>
      %24 = vector.broadcast %23 : vector<1x32xf32> to vector<16x32xf32>
      %25 = arith.mulf %22, %24 : vector<16x32xf32>
      %26 = arith.addf %19, %25 : vector<16x32xf32>
      %c0_20 = arith.constant 0 : index
      %c0_21 = arith.constant 0 : index
      %27 = vector.load %arg5[%c0_20, %c0_21] : memref<1x32xf32, #tpu.memory_space<vmem>>, vector<1x32xf32>
      %28 = vector.broadcast %27 : vector<1x32xf32> to vector<16x32xf32>
      %29 = arith.mulf %22, %28 : vector<16x32xf32>
      %30 = arith.addf %19, %29 : vector<16x32xf32>
      %31 = arith.truncf %26 : vector<16x32xf32> to vector<16x32xbf16>
      %c0_22 = arith.constant 0 : index
      %c0_23 = arith.constant 0 : index
      %32 = vector.load %arg10[%c0_22, %c0_23] : memref<16x32xbf16, #tpu.memory_space<vmem>>, vector<16x32xbf16>
      tpu.vector_store %arg10[%c0_22, %c0_23], %31 {strides = array<i32>} : memref<16x32xbf16, #tpu.memory_space<vmem>>, vector<16x32xbf16>,
      %33 = arith.truncf %30 : vector<16x32xf32> to vector<16x32xbf16>
      %c0_24 = arith.constant 0 : index
      %c0_25 = arith.constant 0 : index
      %34 = vector.load %arg7[%c0_24, %c0_25] : memref<32x32xbf16, #tpu.memory_space<vmem>>, vector<32x32xbf16>
      %cst_26 = arith.constant dense<0.000000e+00> : vector<16x32xf32>
      %35 = tpu.matmul %33, %34, %cst_26 {dimension_numbers = #tpu.dot_dimension_numbers<[1], [0], [0], [1], [0, 0, 1, 1], [], []>} : vector<16x32xbf16>, vector<32x32xbf16>, vector<16x32xf32> -> vector<16x32xf32>
      %36 = arith.negf %35 : vector<16x32xf32>
      %37 = math.exp %36 : vector<16x32xf32>
      %cst_27 = arith.constant 1.000000e+00 : f32
      %38 = vector.broadcast %cst_27 : f32 to vector<16x32xf32>
      %39 = arith.addf %38, %37 : vector<16x32xf32>
      %40 = arith.divf %38, %39 : vector<16x32xf32>
      %c0_28 = arith.constant 0 : index
      %c0_29 = arith.constant 0 : index
      %41 = vector.load %arg11[%c0_28, %c0_29] : memref<16x32xf32, #tpu.memory_space<vmem>>, vector<16x32xf32>
      tpu.vector_store %arg11[%c0_28, %c0_29], %40 {strides = array<i32>} : memref<16x32xf32, #tpu.memory_space<vmem>>, vector<16x32xf32>,
      %cst_30 = arith.constant 0.000000e+00 : f32
      %42 = vector.broadcast %cst_30 : f32 to vector<16x32xf32>
      %c0_31 = arith.constant 0 : index
      %c0_32 = arith.constant 0 : index
      %43 = vector.load %arg12[%c0_31, %c0_32] : memref<16x32xf32, #tpu.memory_space<vmem>>, vector<16x32xf32>
      tpu.vector_store %arg12[%c0_31, %c0_32], %42 {strides = array<i32>} : memref<16x32xf32, #tpu.memory_space<vmem>>, vector<16x32xf32>,
    } else {
    }
    %c0 = arith.constant 0 : index
    %c0_1 = arith.constant 0 : index
    %3 = vector.load %arg10[%c0, %c0_1] : memref<16x32xbf16, #tpu.memory_space<vmem>>, vector<16x32xbf16>
    %c0_2 = arith.constant 0 : index
    %c0_3 = arith.constant 0 : index
    %4 = vector.load %arg6[%c0_2, %c0_3] : memref<32x128xbf16, #tpu.memory_space<vmem>>, vector<32x128xbf16>
    %cst = arith.constant dense<0.000000e+00> : vector<16x128xf32>
    %5 = tpu.matmul %3, %4, %cst {dimension_numbers = #tpu.dot_dimension_numbers<[1], [0], [0], [1], [0, 0, 1, 1], [], []>} : vector<16x32xbf16>, vector<32x128xbf16>, vector<16x128xf32> -> vector<16x128xf32>
    %cst_4 = arith.constant 0.000000e+00 : f32
    %6 = vector.broadcast %cst_4 : f32 to vector<16x128xf32>
    %7 = arith.maximumf %5, %6 : vector<16x128xf32>
    %8 = arith.mulf %7, %7 : vector<16x128xf32>
    %c0_5 = arith.constant 0 : index
    %c0_6 = arith.constant 0 : index
    %9 = vector.load %arg12[%c0_5, %c0_6] : memref<16x32xf32, #tpu.memory_space<vmem>>, vector<16x32xf32>
    %10 = arith.truncf %8 : vector<16x128xf32> to vector<16x128xbf16>
    %c0_7 = arith.constant 0 : index
    %c0_8 = arith.constant 0 : index
    %11 = vector.load %arg8[%c0_7, %c0_8] : memref<128x32xbf16, #tpu.memory_space<vmem>>, vector<128x32xbf16>
    %cst_9 = arith.constant dense<0.000000e+00> : vector<16x32xf32>
    %12 = tpu.matmul %10, %11, %cst_9 {dimension_numbers = #tpu.dot_dimension_numbers<[1], [0], [0], [1], [0, 0, 1, 1], [], []>} : vector<16x128xbf16>, vector<128x32xbf16>, vector<16x32xf32> -> vector<16x32xf32>
    %13 = arith.addf %9, %12 : vector<16x32xf32>
    %c0_10 = arith.constant 0 : index
    %c0_11 = arith.constant 0 : index
    %14 = vector.load %arg12[%c0_10, %c0_11] : memref<16x32xf32, #tpu.memory_space<vmem>>, vector<16x32xf32>
    tpu.vector_store %arg12[%c0_10, %c0_11], %13 {strides = array<i32>} : memref<16x32xf32, #tpu.memory_space<vmem>>, vector<16x32xf32>,
    %c0_i32_12 = arith.constant 0 : i32
    %15 = arith.cmpi eq, %arg1, %c0_i32_12 : i32
    %16 = arith.extui %15 : i1 to i32
    %c0_i32_13 = arith.constant 0 : i32
    %17 = arith.cmpi ne, %16, %c0_i32_13 : i32
    scf.if %17 {
      %c0_14 = arith.constant 0 : index
      %c0_15 = arith.constant 0 : index
      %18 = vector.load %arg11[%c0_14, %c0_15] : memref<16x32xf32, #tpu.memory_space<vmem>>, vector<16x32xf32>
      %c0_16 = arith.constant 0 : index
      %c0_17 = arith.constant 0 : index
      %19 = vector.load %arg12[%c0_16, %c0_17] : memref<16x32xf32, #tpu.memory_space<vmem>>, vector<16x32xf32>
      %20 = arith.mulf %18, %19 : vector<16x32xf32>
      %c0_18 = arith.constant 0 : index
      %c0_19 = arith.constant 0 : index
      %21 = vector.load %arg9[%c0_18, %c0_19] : memref<16x32xf32, #tpu.memory_space<vmem>>, vector<16x32xf32>
      tpu.vector_store %arg9[%c0_18, %c0_19], %20 {strides = array<i32>} : memref<16x32xf32, #tpu.memory_space<vmem>>, vector<16x32xf32>,
    } else {
    }
    return
  }
  func.func @transform_0(%arg0: i32, %arg1: i32) -> (i32, i32) {
    %c0_i32 = arith.constant 0 : i32
    %c0_i32_0 = arith.constant 0 : i32
    return %arg0, %c0_i32 : i32, i32
  }
  func.func @transform_1(%arg0: i32, %arg1: i32) -> (i32, i32) {
    %c0_i32 = arith.constant 0 : i32
    %c0_i32_0 = arith.constant 0 : i32
    return %arg0, %c0_i32 : i32, i32
  }
  func.func @transform_2(%arg0: i32, %arg1: i32) -> (i32, i32) {
    %c0_i32 = arith.constant 0 : i32
    %c0_i32_0 = arith.constant 0 : i32
    %c0_i32_1 = arith.constant 0 : i32
    return %c0_i32, %c0_i32_0 : i32, i32
  }
  func.func @transform_3(%arg0: i32, %arg1: i32) -> (i32, i32) {
    %c0_i32 = arith.constant 0 : i32
    %c0_i32_0 = arith.constant 0 : i32
    %c0_i32_1 = arith.constant 0 : i32
    return %c0_i32, %c0_i32_0 : i32, i32
  }
  func.func @transform_4(%arg0: i32, %arg1: i32) -> (i32, i32) {
    %c0_i32 = arith.constant 0 : i32
    %c0_i32_0 = arith.constant 0 : i32
    return %c0_i32, %arg1 : i32, i32
  }
  func.func @transform_5(%arg0: i32, %arg1: i32) -> (i32, i32) {
    %c0_i32 = arith.constant 0 : i32
    %c0_i32_0 = arith.constant 0 : i32
    %c0_i32_1 = arith.constant 0 : i32
    return %c0_i32, %c0_i32_0 : i32, i32
  }
  func.func @transform_6(%arg0: i32, %arg1: i32) -> (i32, i32) {
    %c0_i32 = arith.constant 0 : i32
    %c0_i32_0 = arith.constant 0 : i32
    return %arg1, %c0_i32 : i32, i32
  }
  func.func @transform_7(%arg0: i32, %arg1: i32) -> (i32, i32) {
    %c0_i32 = arith.constant 0 : i32
    %c0_i32_0 = arith.constant 0 : i32
    return %arg0, %c0_i32 : i32, i32
  }
}

</mosaic_0001>

<bundles_post_ra>
// kernel: tpu_custom_call.1
= control target key start
LH: loop header
LB: loop body
LE: loop exit
PB: predicated region body
PF: predicated region fallthrough
CT: control target
= control target key end

     0   :  { %s521_s0 = inlined_call_operand.vmem [shape: bf16[16,32], index: 0, kind: input, shape index: {}]   ;;  %s522_s1 = inlined_call_operand.vmem [shape: bf16[16,32], index: 1, kind: input, shape index: {}]   ;;  %s523_s2 = inlined_call_operand.vmem [shape: f32[1,32], index: 2, kind: input, shape index: {}]   ;;  %s524_s3 = inlined_call_operand.vmem [shape: f32[1,32], index: 3, kind: input, shape index: {}]   ;;  %s525_s4 = inlined_call_operand.vmem [shape: bf16[32,128], index: 4, kind: input, shape index: {}]   ;;  %s526_s5 = inlined_call_operand.vmem [shape: bf16[32,32], index: 5, kind: input, shape index: {}]   ;;  %s527_s6 = inlined_call_operand.vmem [shape: bf16[128,32], index: 6, kind: input, shape index: {}]   ;;  %s528_s7 = inlined_call_operand.hbm [shape: f32[16,32], index: 7, kind: output, shape index: {}]  }
   0x1   :  { %v359_v0 = vld [vmem:[%s525_s4 + $0x8] sm:$0xff]  ;;  %v369_v1 = vld [vmem:[%s521_s0] sm:$0xff]   ;;  %v367_v11 = vld [vmem:[%s527_s6 + $0x38] sm:$0xff] }
   0x2   :  { %v358_v2 = vld [vmem:[%s525_s4] sm:$0xff]  ;;  %v370_v3 = vunpack.c.l.bf16 %v369_v1  ;;  %v371_v4 = vunpack.c.h.bf16 %v369_v1  ;;  %173 = vmatpush.bf16.msra.mxu1 %v359_v0  ;;  %v356_v9 = vld [vmem:[%s526_s5 + $0x8] sm:$0xff] }
   0x3   :  { %v373_v5 = vld [vmem:[%s522_s1] sm:$0xff]   ;;  %90 = vmatpush.bf16.msra.mxu0 %v356_v9 }
   0x4   :  { %v374_v6 = vunpack.c.l.bf16 %v373_v5  ;;  %v375_v7 = vunpack.c.h.bf16 %v373_v5  ;;  %v380_v8 = vld [vmem:[%s523_s2] ss:$0 sm:$0xff] }
   0x5   :  { %v381_v10 = vld [vmem:[%s524_s3] ss:$0 sm:$0xff] }
   0x6   :  { %v40_v12 = vsub.f32 %v374_v6, %v370_v3  ;;  %v41_v13 = vsub.f32 %v375_v7, %v371_v4  ;;  %v355_v14 = vld [vmem:[%s526_s5] sm:$0xff] }
   0x7   :  { %12 = vsyncpa [#allocation6], 0  ;;  %252 = vmatpush.bf16.msra.mxu2 %v367_v11  ;;  %v366_v15 = vld [vmem:[%s527_s6 + $0x30] sm:$0xff]  ;;  %174 = vmatpush.bf16.msra.mxu1 %v358_v2  ;;  %vm60_vm0 = vcmask 257024   ;;  %v365_v24 = vld [vmem:[%s527_s6 + $0x28] sm:$0xff]  ;;  %vm80_vm1 = vcmask 261120  }
   0x8   :  { %v46_v16 = vmul.f32 %v380_v8, %v40_v12  ;;  %v47_v17 = vmul.f32 %v380_v8, %v41_v13  ;;  %v54_v18 = vmul.f32 %v381_v10, %v40_v12  ;;  %v55_v19 = vmul.f32 %v381_v10, %v41_v13  ;;  %91 = vmatpush.bf16.msra.mxu0 %v355_v14  ;;  %v364_v28 = vld [vmem:[%s527_s6 + $0x20] sm:$0xff]  ;;  %v363_v30 = vld [vmem:[%s527_s6 + $0x18] sm:$0xff]  ;;  %v362_v31 = vld [vmem:[%s527_s6 + $0x10] sm:$0xff]  ;;  %s287_s30 = sshll.u32 %s528_s7, 4  ;;  %s418_s8 = smov 128   ;;  %s288_s30 = int_to_ptr.hbm [resolvable:$true] %s287_s30 }
   0x9   :  { %v361_v32 = vld [vmem:[%s527_s6 + $0x8] sm:$0xff]  ;;  %v360_v33 = vld [vmem:[%s527_s6] sm:$0xff]  ;;  %v416_v36 = vmov 0.0   ;;  %s417_s6 = smov [#allocation5]   ;;  %s419_s9 = smov 8  }
   0xa   :  { %v48_v20 = vadd.f32 %v370_v3, %v46_v16  ;;  %v49_v21 = vadd.f32 %v371_v4, %v47_v17  ;;  %v56_v22 = vadd.f32 %v370_v3, %v54_v18  ;;  %v57_v23 = vadd.f32 %v371_v4, %v55_v19  ;;  %138 = vst.msk [vmem:[#allocation4] sm:$0xff] %vm80_vm1, %v416_v36  ;;  %s285_s27 = sshll.u32 %s417_s6, 4  ;;  %s286_s27 = int_to_ptr.vmem [resolvable:$true] %s285_s27 }
   0xb   :  { %253 = vmatpush.bf16.msra.mxu2 %v366_v15  ;;  %139 = vst.msk [vmem:[#allocation4 + $0x8] sm:$0xff] %vm80_vm1, %v416_v36 }
   0xc   :  { %v58_v25 = vpack.c.bf16 %v48_v20, %v48_v20  ;;  %v59_v26 = vpack.c.bf16 %v49_v21, %v49_v21  ;;  %v63_v27 = vpack.c.bf16 %v57_v23, %v56_v22 }
   0xe   :  { %61 = vst.msk [vmem:[#allocation2] sm:$0xf] %vm60_vm0, %v58_v25  ;;  %307 = vmatmul.msk.bf16.vlgmr.msra.gmra.mxu0 %vm80_vm1, %v63_v27 }
   0xf   :  { %62 = vst.msk [vmem:[#allocation2 + $0x4] sm:$0xf] %vm60_vm0, %v59_v26  ;;  %254 = vmatpush.bf16.msra.mxu2 %v365_v24 }
  0x11   :  { %v185_v6 = vld [vmem:[#allocation4] sm:$0xff] }
  0x12   :  { %v186_v9 = vld [vmem:[#allocation4 + $0x8] sm:$0xff] }
  0x13   :  { %255 = vmatpush.bf16.msra.mxu2 %v364_v28 }
  0x16   :  { %v357_v29 = vld [vmem:[#allocation2] sm:$0xff] }
  0x17   :  { %322 = vmatmul.msk.bf16.vlgmr.msra.gmra.mxu1 %vm80_vm1, %v357_v29  ;;  %256 = vmatpush.bf16.msra.mxu2 %v363_v30 }
  0x1b   :  { %257 = vmatpush.bf16.msra.mxu2 %v362_v31 }
  0x1f   :  { %258 = vmatpush.bf16.msra.mxu2 %v361_v32 }
  0x23   :  { %259 = vmatpush.bf16.msra.mxu2 %v360_v33 }
  0x8b   :  { %v93_v34 = vpop.f32.mrf.mxu0 }
  0x8c   :  { %v308_v35 = vmul.f32 -1.442695, %v93_v34 }
  0x8e   :  { %382 = vpow2.f32 %v308_v35 }
  0x93   :  { %v95_v37 = vpop.f32.mrf.mxu0 }
  0x94   :  { %v383_v38 = vpop.eup %382  ;;  %v309_v39 = vmul.f32 -1.442695, %v95_v37  ;;  %v176_v40 = vpop.f32.mrf.mxu1 }
  0x95   :  { %v104_v41 = vadd.f32 1.0, %v383_v38  ;;  %v181_v43 = vmax.f32 %v176_v40, 0.0 }
  0x96   :  { %384 = vpow2.f32 %v309_v39 }
  0x97   :  { %386 = vrcp.f32 %v104_v41  ;;  %vm111_vm2 = vweird.f32 %v104_v41  ;;  %v115_v49 = vand.u32 2147483647, %v104_v41  ;;  %v117_v50 = vand.u32 2147483648, %v104_v41 }
  0x98   :  { %v183_v51 = vmul.f32 %v181_v43, %v181_v43 }
  0x99   :  { %v118_v56 = vor.u32 1.1754944e-38, %v117_v50  ;;  %vm116_vm5 = vcmp.eq.f32.partialorder %v115_v49, 8.507059e+37 }
  0x9c   :  { %v385_v42 = vpop.eup %384  ;;  %v178_v45 = vpop.f32.mrf.mxu1 }
  0x9d   :  { %v387_v44 = vpop.eup %386  ;;  %v105_v46 = vadd.f32 1.0, %v385_v42  ;;  %v182_v47 = vmax.f32 %v178_v45, 0.0 }
  0x9e   :  { %v107_v48 = vmul.f32 %v387_v44, %v104_v41  ;;  %vm112_vm3 = vweird.f32 %v387_v44 }
  0x9f   :  { %388 = vrcp.f32 %v105_v46  ;;  %v184_v52 = vmul.f32 %v182_v47, %v182_v47  ;;  %vm113_vm4 = vmor %vm111_vm2, %vm112_vm3  ;;  %v132_v62 = vand.u32 2147483648, %v105_v46  ;;  %vm126_vm6 = vweird.f32 %v105_v46 }
  0xa0   :  { %v108_v53 = vsub.f32 1.0, %v107_v48  ;;  %v130_v0 = vand.u32 2147483647, %v105_v46 }
  0xa1   :  { %v187_v54 = vpack.c.bf16 %v184_v52, %v183_v51  ;;  %v133_v2 = vor.u32 1.1754944e-38, %v132_v62 }
  0xa2   :  { %v109_v55 = vmul.f32 %v387_v44, %v108_v53  ;;  %vm131_vm9 = vcmp.eq.f32.partialorder %v130_v0, 8.507059e+37 }
  0xa3   :  { %260 = vmatmul.bf16.vlgmr.msra.gmra.mxu2 %v187_v54 }
  0xa4   :  { %v110_v57 = vadd.f32 %v387_v44, %v109_v55 }
  0xa5   :  { %v389_v58 = vpop.eup %388 }
  0xa6   :  { %v114_v59 = vsel %vm113_vm4, %v387_v44, %v110_v57  ;;  %v122_v60 = vmul.f32 %v389_v58, %v105_v46  ;;  %vm127_vm7 = vweird.f32 %v389_v58 }
  0xa7   :  { %v119_v61 = vsel %vm116_vm5, %v118_v56, %v114_v59  ;;  %vm128_vm8 = vmor %vm126_vm6, %vm127_vm7 }
  0xa8   :  { %136 = vst.msk [vmem:[#allocation3] sm:$0xff] %vm80_vm1, %v119_v61  ;;  %v123_v63 = vsub.f32 1.0, %v122_v60 }
  0xaa   :  { %v124_v1 = vmul.f32 %v389_v58, %v123_v63 }
  0xac   :  { %v125_v3 = vadd.f32 %v389_v58, %v124_v1 }
  0xae   :  { %v129_v4 = vsel %vm128_vm8, %v389_v58, %v125_v3 }
  0xaf   :  { %v134_v5 = vsel %vm131_vm9, %v133_v2, %v129_v4  ;;  %v273_v12 = vld [vmem:[#allocation3] sm:$0xff] }
  0xb0   :  { %137 = vst.msk [vmem:[#allocation3 + $0x8] sm:$0xff] %vm80_vm1, %v134_v5 }
  0xb7   :  { %v274_v15 = vld [vmem:[#allocation3 + $0x8] sm:$0xff] }
 0x126   :  { %v261_v7 = vpop.f32.mrf.mxu2 }
 0x127   :  { %v266_v8 = vadd.f32 %v261_v7, %v185_v6 }
 0x129   :  { %268 = vst.msk [vmem:[#allocation4] sm:$0xff] %vm80_vm1, %v266_v8 }
 0x12e   :  { %v263_v10 = vpop.f32.mrf.mxu2 }
 0x12f   :  { %v267_v11 = vadd.f32 %v263_v10, %v186_v9 }
 0x130   :  { %v275_v13 = vld [vmem:[#allocation4] sm:$0xff] }
 0x131   :  { %269 = vst.msk [vmem:[#allocation4 + $0x8] sm:$0xff] %vm80_vm1, %v267_v11  ;;  %v277_v14 = vmul.f32 %v275_v13, %v273_v12 }
 0x133   :  { %279 = vst.msk [vmem:[#allocation5] sm:$0xff] %vm80_vm1, %v277_v14 }
 0x138   :  { %v276_v16 = vld [vmem:[#allocation4 + $0x8] sm:$0xff] }
 0x139   :  { %v278_v17 = vmul.f32 %v276_v16, %v274_v15 }
 0x13b   :  { %280 = vst.msk [vmem:[#allocation5 + $0x8] sm:$0xff] %vm80_vm1, %v278_v17 }
 0x13c   :  { %293 = dma.vmem_to_hbm [thread:$0]  %s286_s27, 256, %s288_s30, [#allocation6], %s418_s8, %s418_s8, %s419_s9  }
 0x13d   :  { %414 = dma.done.wait [#allocation6], 256  }
 0x13e   :  { %415 = vsyncadd [#allocation6], 4294967040 }
 0x13f   :  { %298 = vsyncpa [#allocation6], 1 }

// kernel: tpu_custom_call.1
= control target key start
LH: loop header
LB: loop body
LE: loop exit
PB: predicated region body
PF: predicated region fallthrough
CT: control target
= control target key end

     0   :  { %s521_s0 = inlined_call_operand.vmem [shape: bf16[16,32], index: 0, kind: input, shape index: {}]   ;;  %s522_s1 = inlined_call_operand.vmem [shape: bf16[16,32], index: 1, kind: input, shape index: {}]   ;;  %s523_s2 = inlined_call_operand.vmem [shape: f32[1,32], index: 2, kind: input, shape index: {}]   ;;  %s524_s3 = inlined_call_operand.vmem [shape: f32[1,32], index: 3, kind: input, shape index: {}]   ;;  %s525_s4 = inlined_call_operand.vmem [shape: bf16[32,128], index: 4, kind: input, shape index: {}]   ;;  %s526_s5 = inlined_call_operand.vmem [shape: bf16[32,32], index: 5, kind: input, shape index: {}]   ;;  %s527_s6 = inlined_call_operand.vmem [shape: bf16[128,32], index: 6, kind: input, shape index: {}]   ;;  %s528_s7 = inlined_call_operand.hbm [shape: f32[16,32], index: 7, kind: output, shape index: {}]  }
   0x1   :  { %v359_v0 = vld [vmem:[%s525_s4 + $0x8] sm:$0xff]  ;;  %v369_v1 = vld [vmem:[%s521_s0] sm:$0xff]   ;;  %v367_v11 = vld [vmem:[%s527_s6 + $0x38] sm:$0xff] }
   0x2   :  { %v358_v2 = vld [vmem:[%s525_s4] sm:$0xff]  ;;  %v370_v3 = vunpack.c.l.bf16 %v369_v1  ;;  %v371_v4 = vunpack.c.h.bf16 %v369_v1  ;;  %173 = vmatpush.bf16.msra.mxu1 %v359_v0  ;;  %v356_v9 = vld [vmem:[%s526_s5 + $0x8] sm:$0xff] }
   0x3   :  { %v373_v5 = vld [vmem:[%s522_s1] sm:$0xff]   ;;  %90 = vmatpush.bf16.msra.mxu0 %v356_v9 }
   0x4   :  { %v374_v6 = vunpack.c.l.bf16 %v373_v5  ;;  %v375_v7 = vunpack.c.h.bf16 %v373_v5  ;;  %v380_v8 = vld [vmem:[%s523_s2] ss:$0 sm:$0xff] }
   0x5   :  { %v381_v10 = vld [vmem:[%s524_s3] ss:$0 sm:$0xff] }
   0x6   :  { %v40_v12 = vsub.f32 %v374_v6, %v370_v3  ;;  %v41_v13 = vsub.f32 %v375_v7, %v371_v4  ;;  %v355_v14 = vld [vmem:[%s526_s5] sm:$0xff] }
   0x7   :  { %12 = vsyncpa [#allocation6], 0  ;;  %252 = vmatpush.bf16.msra.mxu2 %v367_v11  ;;  %v366_v15 = vld [vmem:[%s527_s6 + $0x30] sm:$0xff]  ;;  %174 = vmatpush.bf16.msra.mxu1 %v358_v2  ;;  %vm60_vm0 = vcmask 257024   ;;  %v365_v24 = vld [vmem:[%s527_s6 + $0x28] sm:$0xff]  ;;  %vm80_vm1 = vcmask 261120  }
   0x8   :  { %v46_v16 = vmul.f32 %v380_v8, %v40_v12  ;;  %v47_v17 = vmul.f32 %v380_v8, %v41_v13  ;;  %v54_v18 = vmul.f32 %v381_v10, %v40_v12  ;;  %v55_v19 = vmul.f32 %v381_v10, %v41_v13  ;;  %91 = vmatpush.bf16.msra.mxu0 %v355_v14  ;;  %v364_v28 = vld [vmem:[%s527_s6 + $0x20] sm:$0xff]  ;;  %v363_v30 = vld [vmem:[%s527_s6 + $0x18] sm:$0xff]  ;;  %v362_v31 = vld [vmem:[%s527_s6 + $0x10] sm:$0xff]  ;;  %s287_s30 = sshll.u32 %s528_s7, 4  ;;  %s418_s8 = smov 128   ;;  %s288_s30 = int_to_ptr.hbm [resolvable:$true] %s287_s30 }
   0x9   :  { %v361_v32 = vld [vmem:[%s527_s6 + $0x8] sm:$0xff]  ;;  %v360_v33 = vld [vmem:[%s527_s6] sm:$0xff]  ;;  %v416_v36 = vmov 0.0   ;;  %s417_s6 = smov [#allocation5]   ;;  %s419_s9 = smov 8  }
   0xa   :  { %v48_v20 = vadd.f32 %v370_v3, %v46_v16  ;;  %v49_v21 = vadd.f32 %v371_v4, %v47_v17  ;;  %v56_v22 = vadd.f32 %v370_v3, %v54_v18  ;;  %v57_v23 = vadd.f32 %v371_v4, %v55_v19  ;;  %138 = vst.msk [vmem:[#allocation4] sm:$0xff] %vm80_vm1, %v416_v36  ;;  %s285_s27 = sshll.u32 %s417_s6, 4  ;;  %s286_s27 = int_to_ptr.vmem [resolvable:$true] %s285_s27 }
   0xb   :  { %253 = vmatpush.bf16.msra.mxu2 %v366_v15  ;;  %139 = vst.msk [vmem:[#allocation4 + $0x8] sm:$0xff] %vm80_vm1, %v416_v36 }
   0xc   :  { %v58_v25 = vpack.c.bf16 %v48_v20, %v48_v20  ;;  %v59_v26 = vpack.c.bf16 %v49_v21, %v49_v21  ;;  %v63_v27 = vpack.c.bf16 %v57_v23, %v56_v22 }
   0xe   :  { %61 = vst.msk [vmem:[#allocation2] sm:$0xf] %vm60_vm0, %v58_v25  ;;  %307 = vmatmul.msk.bf16.vlgmr.msra.gmra.mxu0 %vm80_vm1, %v63_v27 }
   0xf   :  { %62 = vst.msk [vmem:[#allocation2 + $0x4] sm:$0xf] %vm60_vm0, %v59_v26  ;;  %254 = vmatpush.bf16.msra.mxu2 %v365_v24 }
  0x11   :  { %v185_v6 = vld [vmem:[#allocation4] sm:$0xff] }
  0x12   :  { %v186_v9 = vld [vmem:[#allocation4 + $0x8] sm:$0xff] }
  0x13   :  { %255 = vmatpush.bf16.msra.mxu2 %v364_v28 }
  0x16   :  { %v357_v29 = vld [vmem:[#allocation2] sm:$0xff] }
  0x17   :  { %322 = vmatmul.msk.bf16.vlgmr.msra.gmra.mxu1 %vm80_vm1, %v357_v29  ;;  %256 = vmatpush.bf16.msra.mxu2 %v363_v30 }
  0x1b   :  { %257 = vmatpush.bf16.msra.mxu2 %v362_v31 }
  0x1f   :  { %258 = vmatpush.bf16.msra.mxu2 %v361_v32 }
  0x23   :  { %259 = vmatpush.bf16.msra.mxu2 %v360_v33 }
  0x8b   :  { %v93_v34 = vpop.f32.mrf.mxu0 }
  0x8c   :  { %v308_v35 = vmul.f32 -1.442695, %v93_v34 }
  0x8e   :  { %382 = vpow2.f32 %v308_v35 }
  0x93   :  { %v95_v37 = vpop.f32.mrf.mxu0 }
  0x94   :  { %v383_v38 = vpop.eup %382  ;;  %v309_v39 = vmul.f32 -1.442695, %v95_v37  ;;  %v176_v40 = vpop.f32.mrf.mxu1 }
  0x95   :  { %v104_v41 = vadd.f32 1.0, %v383_v38  ;;  %v181_v43 = vmax.f32 %v176_v40, 0.0 }
  0x96   :  { %384 = vpow2.f32 %v309_v39 }
  0x97   :  { %386 = vrcp.f32 %v104_v41  ;;  %vm111_vm2 = vweird.f32 %v104_v41  ;;  %v115_v49 = vand.u32 2147483647, %v104_v41  ;;  %v117_v50 = vand.u32 2147483648, %v104_v41 }
  0x98   :  { %v183_v51 = vmul.f32 %v181_v43, %v181_v43 }
  0x99   :  { %v118_v56 = vor.u32 1.1754944e-38, %v117_v50  ;;  %vm116_vm5 = vcmp.eq.f32.partialorder %v115_v49, 8.507059e+37 }
  0x9c   :  { %v385_v42 = vpop.eup %384  ;;  %v178_v45 = vpop.f32.mrf.mxu1 }
  0x9d   :  { %v387_v44 = vpop.eup %386  ;;  %v105_v46 = vadd.f32 1.0, %v385_v42  ;;  %v182_v47 = vmax.f32 %v178_v45, 0.0 }
  0x9e   :  { %v107_v48 = vmul.f32 %v387_v44, %v104_v41  ;;  %vm112_vm3 = vweird.f32 %v387_v44 }
  0x9f   :  { %388 = vrcp.f32 %v105_v46  ;;  %v184_v52 = vmul.f32 %v182_v47, %v182_v47  ;;  %vm113_vm4 = vmor %vm111_vm2, %vm112_vm3  ;;  %v132_v62 = vand.u32 2147483648, %v105_v46  ;;  %vm126_vm6 = vweird.f32 %v105_v46 }
  0xa0   :  { %v108_v53 = vsub.f32 1.0, %v107_v48  ;;  %v130_v0 = vand.u32 2147483647, %v105_v46 }
  0xa1   :  { %v187_v54 = vpack.c.bf16 %v184_v52, %v183_v51  ;;  %v133_v2 = vor.u32 1.1754944e-38, %v132_v62 }
  0xa2   :  { %v109_v55 = vmul.f32 %v387_v44, %v108_v53  ;;  %vm131_vm9 = vcmp.eq.f32.partialorder %v130_v0, 8.507059e+37 }
  0xa3   :  { %260 = vmatmul.bf16.vlgmr.msra.gmra.mxu2 %v187_v54 }
  0xa4   :  { %v110_v57 = vadd.f32 %v387_v44, %v109_v55 }
  0xa5   :  { %v389_v58 = vpop.eup %388 }
  0xa6   :  { %v114_v59 = vsel %vm113_vm4, %v387_v44, %v110_v57  ;;  %v122_v60 = vmul.f32 %v389_v58, %v105_v46  ;;  %vm127_vm7 = vweird.f32 %v389_v58 }
  0xa7   :  { %v119_v61 = vsel %vm116_vm5, %v118_v56, %v114_v59  ;;  %vm128_vm8 = vmor %vm126_vm6, %vm127_vm7 }
  0xa8   :  { %136 = vst.msk [vmem:[#allocation3] sm:$0xff] %vm80_vm1, %v119_v61  ;;  %v123_v63 = vsub.f32 1.0, %v122_v60 }
  0xaa   :  { %v124_v1 = vmul.f32 %v389_v58, %v123_v63 }
  0xac   :  { %v125_v3 = vadd.f32 %v389_v58, %v124_v1 }
  0xae   :  { %v129_v4 = vsel %vm128_vm8, %v389_v58, %v125_v3 }
  0xaf   :  { %v134_v5 = vsel %vm131_vm9, %v133_v2, %v129_v4  ;;  %v273_v12 = vld [vmem:[#allocation3] sm:$0xff] }
  0xb0   :  { %137 = vst.msk [vmem:[#allocation3 + $0x8] sm:$0xff] %vm80_vm1, %v134_v5 }
  0xb7   :  { %v274_v15 = vld [vmem:[#allocation3 + $0x8] sm:$0xff] }
 0x126   :  { %v261_v7 = vpop.f32.mrf.mxu2 }
 0x127   :  { %v266_v8 = vadd.f32 %v261_v7, %v185_v6 }
 0x129   :  { %268 = vst.msk [vmem:[#allocation4] sm:$0xff] %vm80_vm1, %v266_v8 }
 0x12e   :  { %v263_v10 = vpop.f32.mrf.mxu2 }
 0x12f   :  { %v267_v11 = vadd.f32 %v263_v10, %v186_v9 }
 0x130   :  { %v275_v13 = vld [vmem:[#allocation4] sm:$0xff] }
 0x131   :  { %269 = vst.msk [vmem:[#allocation4 + $0x8] sm:$0xff] %vm80_vm1, %v267_v11  ;;  %v277_v14 = vmul.f32 %v275_v13, %v273_v12 }
 0x133   :  { %279 = vst.msk [vmem:[#allocation5] sm:$0xff] %vm80_vm1, %v277_v14 }
 0x138   :  { %v276_v16 = vld [vmem:[#allocation4 + $0x8] sm:$0xff] }
 0x139   :  { %v278_v17 = vmul.f32 %v276_v16, %v274_v15 }
 0x13b   :  { %280 = vst.msk [vmem:[#allocation5 + $0x8] sm:$0xff] %vm80_vm1, %v278_v17 }
 0x13c   :  { %293 = dma.vmem_to_hbm [thread:$0]  %s286_s27, 256, %s288_s30, [#allocation6], %s418_s8, %s418_s8, %s419_s9  }
 0x13d   :  { %414 = dma.done.wait [#allocation6], 256  }
 0x13e   :  { %415 = vsyncadd [#allocation6], 4294967040 }
 0x13f   :  { %298 = vsyncpa [#allocation6], 1 }

</bundles_post_ra>
